<compile_context>
chip_gen: v7x
topology: tpu7x:2x2x1
jax: 0.10.0
libtpu: 0.0.40
codegen_flags: <defaults>
</compile_context>

<pallas_src>
import jax
import jax.numpy as jnp
from jax.experimental import pallas as pl
from jax.experimental.pallas import tpu as pltpu

EPS = 1e-5
LANE_ALIGN = 256          # multiple of 128 (v5e) and of 256 (v6e/v7x MXU N-dim)
DEFAULT_TILE_B = 8192     # lanes (batch rows) per grid step

# Packed parameter slab layout inside the (112, 128) f32 slab.
# Every weight block starts on a multiple-of-8 row (sublane tile boundary).
#   w1 (36, 9) -> [  0: 36,  0: 9]    b1 (36,) -> [  0: 36,  9:10]
#   w2 (15,36) -> [ 40: 55,  0:36]    b2 (15,) -> [ 40: 55, 36:37]
#   w3 (12,15) -> [ 56: 68,  0:15]    b3 (12,) -> [ 56: 68, 15:16]
#   w4 ( 6,12) -> [ 72: 78,  0:12]    b4 ( 6,) -> [ 72: 78, 12:13]
#   w5 ( 3, 6) -> [ 80: 83,  0: 6]    b5 ( 3,) -> [ 80: 83,  6: 7]
#   w6 ( 1, 3) -> [ 88: 89,  0: 3]    b6 ( 1,) -> [ 88: 89,  3: 4]
#   gamma (9,) -> [ 96:105,  0: 1]    beta (9,) -> [ 96:105,  1: 2]
SLAB_SHAPE = (112, 128)
ROW = {"w1": 0, "w2": 40, "w3": 56, "w4": 72, "w5": 80, "w6": 88, "ln": 96}


def slouch_kernel(x_ref, p_ref, o_ref):
    # x_ref: (9, TILE_B) -- features on sublanes, batch on lanes.
    h = x_ref[...].astype(jnp.float32)

    # LayerNorm over the 9 features (sublane axis); PyTorch eps=1e-5, affine.
    gamma = p_ref[ROW["ln"]:ROW["ln"] + 9, 0:1]
    beta = p_ref[ROW["ln"]:ROW["ln"] + 9, 1:2]
    mean = jnp.mean(h, axis=0, keepdims=True)
    cent = h - mean
    var = jnp.mean(cent * cent, axis=0, keepdims=True)
    h = cent * jax.lax.rsqrt(var + EPS)
    h = h * gamma + beta

    def linear(h, r0, n_out, n_in):
        w = p_ref[r0:r0 + n_out, 0:n_in]          # (out, in), PyTorch layout
        b = p_ref[r0:r0 + n_out, n_in:n_in + 1]   # (out, 1), broadcast along lanes
        return jnp.dot(w, h, preferred_element_type=jnp.float32) + b

    h = jnp.maximum(linear(h, ROW["w1"], 36, 9), 0.0)   # Linear(9,36)  + ReLU
    h = jnp.maximum(linear(h, ROW["w2"], 15, 36), 0.0)  # Linear(36,15) + ReLU (+Dropout=id)
    h = jnp.maximum(linear(h, ROW["w3"], 12, 15), 0.0)  # Linear(15,12) + ReLU
    h = jnp.maximum(linear(h, ROW["w4"], 6, 12), 0.0)   # Linear(12,6)  + ReLU
    h = jnp.maximum(linear(h, ROW["w5"], 3, 6), 0.0)    # Linear(6,3) (+Dropout=id) + ReLU
    h = linear(h, ROW["w6"], 1, 3)                      # Linear(3,1)
    o_ref[...] = jax.nn.sigmoid(h).astype(o_ref.dtype)  # lane-dense (1, TILE_B) store


def pack_params(p):
    """Pack all 14 small parameter tensors into one (112, 128) f32 slab."""
    slab = jnp.zeros(SLAB_SHAPE, jnp.float32)
    slab = slab.at[ROW["w1"]:ROW["w1"] + 36, 0:9].set(p["w1"])
    slab = slab.at[ROW["w1"]:ROW["w1"] + 36, 9:10].set(p["b1"].reshape(36, 1))
    slab = slab.at[ROW["w2"]:ROW["w2"] + 15, 0:36].set(p["w2"])
    slab = slab.at[ROW["w2"]:ROW["w2"] + 15, 36:37].set(p["b2"].reshape(15, 1))
    slab = slab.at[ROW["w3"]:ROW["w3"] + 12, 0:15].set(p["w3"])
    slab = slab.at[ROW["w3"]:ROW["w3"] + 12, 15:16].set(p["b3"].reshape(12, 1))
    slab = slab.at[ROW["w4"]:ROW["w4"] + 6, 0:12].set(p["w4"])
    slab = slab.at[ROW["w4"]:ROW["w4"] + 6, 12:13].set(p["b4"].reshape(6, 1))
    slab = slab.at[ROW["w5"]:ROW["w5"] + 3, 0:6].set(p["w5"])
    slab = slab.at[ROW["w5"]:ROW["w5"] + 3, 6:7].set(p["b5"].reshape(3, 1))
    slab = slab.at[ROW["w6"]:ROW["w6"] + 1, 0:3].set(p["w6"])
    slab = slab.at[ROW["w6"]:ROW["w6"] + 1, 3:4].set(p["b6"].reshape(1, 1))
    slab = slab.at[ROW["ln"]:ROW["ln"] + 9, 0:1].set(p["gamma"].reshape(9, 1))
    slab = slab.at[ROW["ln"]:ROW["ln"] + 9, 1:2].set(p["beta"].reshape(9, 1))
    return slab


def slouch_detection_forward(x, params, tile_b=DEFAULT_TILE_B):
    """x: (B, 9) float32. params: PyTorch-layout weights. Returns (B, 1) float32."""
    B = x.shape[0]
    # Lane-aligned batch tile; don't over-tile tiny batches.
    tile_b = max(LANE_ALIGN, min(tile_b, pl.cdiv(B, LANE_ALIGN) * LANE_ALIGN))
    padded_b = pl.cdiv(B, tile_b) * tile_b
    n_tiles = padded_b // tile_b

    # Batch on lanes: transpose + zero-pad to (9, padded_b). Padded columns run
    # through the net harmlessly (LayerNorm of zeros -> beta) and are sliced off.
    xt = jnp.zeros((9, padded_b), jnp.float32).at[:, :B].set(
        jnp.asarray(x, jnp.float32).T)
    slab = pack_params(params)

    out = pl.pallas_call(
        slouch_kernel,
        out_shape=jax.ShapeDtypeStruct((1, padded_b), jnp.float32),
        grid=(n_tiles,),
        in_specs=[
            pl.BlockSpec((9, tile_b), lambda i: (0, i)),        # batch-tiled input
            pl.BlockSpec(SLAB_SHAPE, lambda i: (0, 0)),         # resident params
        ],
        out_specs=pl.BlockSpec((1, tile_b), lambda i: (0, i)),  # lane-dense output
        compiler_params=pltpu.CompilerParams(
            # Independent batch tiles -> shard grid steps across both TCs on v7x.
            # Per-step footprint (~1.3 MB @ 8192 lanes, double-buffered) fits
            # every generation's default scoped-VMEM limit; no override needed.
            dimension_semantics=("parallel",),
        ),
        cost_estimate=pl.CostEstimate(
            flops=2500 * padded_b,            # ~2.3K matmul FLOPs/row + LN/bias
            transcendentals=2 * padded_b,     # rsqrt + sigmoid per row
            bytes_accessed=40 * padded_b + 4 * SLAB_SHAPE[0] * SLAB_SHAPE[1],
        ),
    )(xt, slab)
    return out[0, :B].reshape(B, 1)


def init_params(key):
    """Deterministic init mimicking PyTorch defaults (uniform +-1/sqrt(fan_in)).
    Weights in PyTorch's native (out, in) layout, biases 1-D."""
    dims = [(9, 36), (36, 15), (15, 12), (12, 6), (6, 3), (3, 1)]
    params = {
        "gamma": jnp.ones((9,), jnp.float32),   # LayerNorm weight
        "beta": jnp.zeros((9,), jnp.float32),   # LayerNorm bias
    }
    for i, (fan_in, fan_out) in enumerate(dims, start=1):
        key, kw, kb = jax.random.split(key, 3)
        bound = 1.0 / (fan_in ** 0.5)
        params[f"w{i}"] = jax.random.uniform(
            kw, (fan_out, fan_in), jnp.float32, minval=-bound, maxval=bound)
        params[f"b{i}"] = jax.random.uniform(
            kb, (fan_out,), jnp.float32, minval=-bound, maxval=bound)
    return params


def reference_forward(x, p):
    """Pure-JAX reference for correctness checking (eval-mode dropout = identity)."""
    mean = jnp.mean(x, axis=-1, keepdims=True)
    var = jnp.mean((x - mean) ** 2, axis=-1, keepdims=True)
    h = (x - mean) / jnp.sqrt(var + EPS) * p["gamma"] + p["beta"]
    h = jnp.maximum(h @ p["w1"].T + p["b1"], 0.0)
    h = jnp.maximum(h @ p["w2"].T + p["b2"], 0.0)
    h = jnp.maximum(h @ p["w3"].T + p["b3"], 0.0)
    h = jnp.maximum(h @ p["w4"].T + p["b4"], 0.0)
    h = jnp.maximum(h @ p["w5"].T + p["b5"], 0.0)
    return jax.nn.sigmoid(h @ p["w6"].T + p["b6"])


if __name__ == "__main__":
    key = jax.random.PRNGKey(0)
    key, kx = jax.random.split(key)

    batch = 8
    x = jax.random.normal(kx, (batch, 9), jnp.float32)
    params = init_params(key)

    out = slouch_detection_forward(x, params)
    out = jax.block_until_ready(out)

    ref = reference_forward(x, params)
    assert out.shape == (batch, 1), out.shape
    assert jnp.allclose(out, ref, atol=1e-5, rtol=1e-5), (out, ref)

    print("KERNEL_OK")
</pallas_src>

<mosaic_0001>
module attributes {stable_mosaic.version = 11 : i64} {
  func.func @slouch_kernel(%arg0: i32, %arg1: memref<9x256xf32, #tpu.memory_space<vmem>>, %arg2: memref<112x128xf32, #tpu.memory_space<vmem>>, %arg3: memref<1x256xf32, #tpu.memory_space<vmem>>) attributes {dimension_semantics = [#tpu.dimension_semantics<parallel>], iteration_bounds = array<i64: 1>, scalar_prefetch = 0 : i64, scratch_operands = 0 : i64, tpu.core_type = #tpu.core_type<tc>, window_params = [{transform_indices = @transform_0, window_bounds = array<i64: 9, 256>}, {pipeline_mode = #tpu.pipeline_mode<synchronous>, transform_indices = @transform_1, window_bounds = array<i64: 112, 128>}, {transform_indices = @transform_2, window_bounds = array<i64: 1, 256>}]} {
    %c0 = arith.constant 0 : index
    %c0_0 = arith.constant 0 : index
    %0 = vector.load %arg1[%c0, %c0_0] : memref<9x256xf32, #tpu.memory_space<vmem>>, vector<9x256xf32>
    %c96 = arith.constant 96 : index
    %c0_1 = arith.constant 0 : index
    %1 = vector.load %arg2[%c96, %c0_1] : memref<112x128xf32, #tpu.memory_space<vmem>>, vector<9x1xf32>
    %c96_2 = arith.constant 96 : index
    %c1 = arith.constant 1 : index
    %2 = vector.load %arg2[%c96_2, %c1] : memref<112x128xf32, #tpu.memory_space<vmem>>, vector<9x1xf32>
    %cst = arith.constant dense<0.000000e+00> : vector<256xf32>
    %3 = vector.multi_reduction <add>, %0, %cst [0] : vector<9x256xf32> to vector<256xf32>
    %4 = vector.shape_cast %3 : vector<256xf32> to vector<1x256xf32>
    %cst_3 = arith.constant 9.000000e+00 : f32
    %5 = vector.broadcast %cst_3 : f32 to vector<1x256xf32>
    %6 = arith.divf %4, %5 : vector<1x256xf32>
    %7 = vector.broadcast %6 : vector<1x256xf32> to vector<9x256xf32>
    %8 = arith.subf %0, %7 : vector<9x256xf32>
    %9 = arith.mulf %8, %8 : vector<9x256xf32>
    %cst_4 = arith.constant dense<0.000000e+00> : vector<256xf32>
    %10 = vector.multi_reduction <add>, %9, %cst_4 [0] : vector<9x256xf32> to vector<256xf32>
    %11 = vector.shape_cast %10 : vector<256xf32> to vector<1x256xf32>
    %cst_5 = arith.constant 9.000000e+00 : f32
    %12 = vector.broadcast %cst_5 : f32 to vector<1x256xf32>
    %13 = arith.divf %11, %12 : vector<1x256xf32>
    %cst_6 = arith.constant 9.99999974E-6 : f32
    %14 = vector.broadcast %cst_6 : f32 to vector<1x256xf32>
    %15 = arith.addf %13, %14 : vector<1x256xf32>
    %16 = math.rsqrt %15 : vector<1x256xf32>
    %17 = vector.broadcast %16 : vector<1x256xf32> to vector<9x256xf32>
    %18 = arith.mulf %8, %17 : vector<9x256xf32>
    %19 = vector.broadcast %1 : vector<9x1xf32> to vector<9x256xf32>
    %20 = arith.mulf %18, %19 : vector<9x256xf32>
    %21 = vector.broadcast %2 : vector<9x1xf32> to vector<9x256xf32>
    %22 = arith.addf %20, %21 : vector<9x256xf32>
    %c0_7 = arith.constant 0 : index
    %c0_8 = arith.constant 0 : index
    %23 = vector.load %arg2[%c0_7, %c0_8] : memref<112x128xf32, #tpu.memory_space<vmem>>, vector<36x9xf32>
    %c0_9 = arith.constant 0 : index
    %c9 = arith.constant 9 : index
    %24 = vector.load %arg2[%c0_9, %c9] : memref<112x128xf32, #tpu.memory_space<vmem>>, vector<36x1xf32>
    %cst_10 = arith.constant dense<0.000000e+00> : vector<36x256xf32>
    %25 = tpu.matmul %23, %22, %cst_10 {dimension_numbers = #tpu.dot_dimension_numbers<[1], [0], [0], [1], [0, 0, 1, 1], [], []>} : vector<36x9xf32>, vector<9x256xf32>, vector<36x256xf32> -> vector<36x256xf32>
    %26 = vector.broadcast %24 : vector<36x1xf32> to vector<36x256xf32>
    %27 = arith.addf %25, %26 : vector<36x256xf32>
    %cst_11 = arith.constant 0.000000e+00 : f32
    %28 = vector.broadcast %cst_11 : f32 to vector<36x256xf32>
    %29 = arith.maximumf %27, %28 : vector<36x256xf32>
    %c40 = arith.constant 40 : index
    %c0_12 = arith.constant 0 : index
    %30 = vector.load %arg2[%c40, %c0_12] : memref<112x128xf32, #tpu.memory_space<vmem>>, vector<15x36xf32>
    %c40_13 = arith.constant 40 : index
    %c36 = arith.constant 36 : index
    %31 = vector.load %arg2[%c40_13, %c36] : memref<112x128xf32, #tpu.memory_space<vmem>>, vector<15x1xf32>
    %cst_14 = arith.constant dense<0.000000e+00> : vector<15x256xf32>
    %32 = tpu.matmul %30, %29, %cst_14 {dimension_numbers = #tpu.dot_dimension_numbers<[1], [0], [0], [1], [0, 0, 1, 1], [], []>} : vector<15x36xf32>, vector<36x256xf32>, vector<15x256xf32> -> vector<15x256xf32>
    %33 = vector.broadcast %31 : vector<15x1xf32> to vector<15x256xf32>
    %34 = arith.addf %32, %33 : vector<15x256xf32>
    %cst_15 = arith.constant 0.000000e+00 : f32
    %35 = vector.broadcast %cst_15 : f32 to vector<15x256xf32>
    %36 = arith.maximumf %34, %35 : vector<15x256xf32>
    %c56 = arith.constant 56 : index
    %c0_16 = arith.constant 0 : index
    %37 = vector.load %arg2[%c56, %c0_16] : memref<112x128xf32, #tpu.memory_space<vmem>>, vector<12x15xf32>
    %c56_17 = arith.constant 56 : index
    %c15 = arith.constant 15 : index
    %38 = vector.load %arg2[%c56_17, %c15] : memref<112x128xf32, #tpu.memory_space<vmem>>, vector<12x1xf32>
    %cst_18 = arith.constant dense<0.000000e+00> : vector<12x256xf32>
    %39 = tpu.matmul %37, %36, %cst_18 {dimension_numbers = #tpu.dot_dimension_numbers<[1], [0], [0], [1], [0, 0, 1, 1], [], []>} : vector<12x15xf32>, vector<15x256xf32>, vector<12x256xf32> -> vector<12x256xf32>
    %40 = vector.broadcast %38 : vector<12x1xf32> to vector<12x256xf32>
    %41 = arith.addf %39, %40 : vector<12x256xf32>
    %cst_19 = arith.constant 0.000000e+00 : f32
    %42 = vector.broadcast %cst_19 : f32 to vector<12x256xf32>
    %43 = arith.maximumf %41, %42 : vector<12x256xf32>
    %c72 = arith.constant 72 : index
    %c0_20 = arith.constant 0 : index
    %44 = vector.load %arg2[%c72, %c0_20] : memref<112x128xf32, #tpu.memory_space<vmem>>, vector<6x12xf32>
    %c72_21 = arith.constant 72 : index
    %c12 = arith.constant 12 : index
    %45 = vector.load %arg2[%c72_21, %c12] : memref<112x128xf32, #tpu.memory_space<vmem>>, vector<6x1xf32>
    %cst_22 = arith.constant dense<0.000000e+00> : vector<6x256xf32>
    %46 = tpu.matmul %44, %43, %cst_22 {dimension_numbers = #tpu.dot_dimension_numbers<[1], [0], [0], [1], [0, 0, 1, 1], [], []>} : vector<6x12xf32>, vector<12x256xf32>, vector<6x256xf32> -> vector<6x256xf32>
    %47 = vector.broadcast %45 : vector<6x1xf32> to vector<6x256xf32>
    %48 = arith.addf %46, %47 : vector<6x256xf32>
    %cst_23 = arith.constant 0.000000e+00 : f32
    %49 = vector.broadcast %cst_23 : f32 to vector<6x256xf32>
    %50 = arith.maximumf %48, %49 : vector<6x256xf32>
    %c80 = arith.constant 80 : index
    %c0_24 = arith.constant 0 : index
    %51 = vector.load %arg2[%c80, %c0_24] : memref<112x128xf32, #tpu.memory_space<vmem>>, vector<3x6xf32>
    %c80_25 = arith.constant 80 : index
    %c6 = arith.constant 6 : index
    %52 = vector.load %arg2[%c80_25, %c6] : memref<112x128xf32, #tpu.memory_space<vmem>>, vector<3x1xf32>
    %cst_26 = arith.constant dense<0.000000e+00> : vector<3x256xf32>
    %53 = tpu.matmul %51, %50, %cst_26 {dimension_numbers = #tpu.dot_dimension_numbers<[1], [0], [0], [1], [0, 0, 1, 1], [], []>} : vector<3x6xf32>, vector<6x256xf32>, vector<3x256xf32> -> vector<3x256xf32>
    %54 = vector.broadcast %52 : vector<3x1xf32> to vector<3x256xf32>
    %55 = arith.addf %53, %54 : vector<3x256xf32>
    %cst_27 = arith.constant 0.000000e+00 : f32
    %56 = vector.broadcast %cst_27 : f32 to vector<3x256xf32>
    %57 = arith.maximumf %55, %56 : vector<3x256xf32>
    %c88 = arith.constant 88 : index
    %c0_28 = arith.constant 0 : index
    %58 = vector.load %arg2[%c88, %c0_28] : memref<112x128xf32, #tpu.memory_space<vmem>>, vector<1x3xf32>
    %c88_29 = arith.constant 88 : index
    %c3 = arith.constant 3 : index
    %59 = vector.load %arg2[%c88_29, %c3] : memref<112x128xf32, #tpu.memory_space<vmem>>, vector<1x1xf32>
    %cst_30 = arith.constant dense<0.000000e+00> : vector<1x256xf32>
    %60 = tpu.matmul %58, %57, %cst_30 {dimension_numbers = #tpu.dot_dimension_numbers<[1], [0], [0], [1], [0, 0, 1, 1], [], []>} : vector<1x3xf32>, vector<3x256xf32>, vector<1x256xf32> -> vector<1x256xf32>
    %61 = vector.broadcast %59 : vector<1x1xf32> to vector<1x256xf32>
    %62 = arith.addf %60, %61 : vector<1x256xf32>
    %63 = arith.negf %62 : vector<1x256xf32>
    %64 = math.exp %63 : vector<1x256xf32>
    %cst_31 = arith.constant 1.000000e+00 : f32
    %65 = vector.broadcast %cst_31 : f32 to vector<1x256xf32>
    %66 = arith.addf %65, %64 : vector<1x256xf32>
    %67 = arith.divf %65, %66 : vector<1x256xf32>
    %c0_32 = arith.constant 0 : index
    %c0_33 = arith.constant 0 : index
    %68 = vector.load %arg3[%c0_32, %c0_33] : memref<1x256xf32, #tpu.memory_space<vmem>>, vector<1x256xf32>
    tpu.vector_store %arg3[%c0_32, %c0_33], %67 {strides = array<i32>} : memref<1x256xf32, #tpu.memory_space<vmem>>, vector<1x256xf32>,
    return
  }
  func.func @transform_0(%arg0: i32) -> (i32, i32) {
    %c0_i32 = arith.constant 0 : i32
    %c0_i32_0 = arith.constant 0 : i32
    return %c0_i32, %arg0 : i32, i32
  }
  func.func @transform_1(%arg0: i32) -> (i32, i32) {
    %c0_i32 = arith.constant 0 : i32
    %c0_i32_0 = arith.constant 0 : i32
    %c0_i32_1 = arith.constant 0 : i32
    return %c0_i32, %c0_i32_0 : i32, i32
  }
  func.func @transform_2(%arg0: i32) -> (i32, i32) {
    %c0_i32 = arith.constant 0 : i32
    %c0_i32_0 = arith.constant 0 : i32
    return %c0_i32, %arg0 : i32, i32
  }
}

</mosaic_0001>

<bundles_post_ra>
// kernel: tpu_custom_call.1
= control target key start
LH: loop header
LB: loop body
LE: loop exit
PB: predicated region body
PF: predicated region fallthrough
CT: control target
= control target key end

     0   :  { %7 = vsyncpa [#allocation3], 0  ;;  %s1080_s0 = inlined_call_operand.hbm [shape: f32[9,256], index: 0, kind: input, shape index: {}]   ;;  %s1081_s1 = inlined_call_operand.hbm [shape: f32[112,128], index: 1, kind: input, shape index: {}]   ;;  %s1082_s2 = inlined_call_operand.hbm [shape: f32[1,256], index: 2, kind: output, shape index: {}]  }
   0x1   :  { %8 = vsyncpa [#allocation6], 0 }
   0x2   :  { %9 = vsyncpa [#allocation4], 0  ;;  %s968_s9 = smov [#allocation2]   ;;  %s896_s13 = scalar_lea.hbm %s1080_s0, 512 }
   0x3   :  { %s15_s10 = sshll.u32 %s968_s9, 4  ;;  %p897_p0 = scmp.ne.s32.totalorder %s1080_s0, %s896_s13  ;;  %s16_s10 = int_to_ptr.vmem [resolvable:$true] %s15_s10 }
   0x4   :  { %p900_p1 = scmp.lt.u32.totalorder %s896_s13, %s1080_s0 }
   0x6   :  { %p902_p2 = pnand %p900_p1, %p897_p0 }
   0x8   :  { %905 = shalt.err (!%p902_p2)
}
   0x9   :  { %s906_s18 = scalar_lea.vmem %s16_s10, 512  ;;  %p911_p4 = scmp.lt.s32.totalorder %s16_s10, %s16_s10 }
   0xa   :  { %p907_p3 = scmp.ne.s32.totalorder %s16_s10, %s906_s18  ;;  %p912_p5 = scmp.lt.s32.totalorder %s906_s18, %s906_s18 }
   0xc   :  { %p913_p6 = por %p912_p5, %p911_p4 }
   0xe   :  { %p914_p7 = pnand %p913_p6, %p907_p3 }
  0x10   :  { %917 = shalt.err (!%p914_p7)
}
  0x11   :  { %s969_s19 = smov 256   ;;  %s970_s20 = smov 16  }
  0x12   :  { %21 = dma.hbm_to_vmem [thread:$0]  %s1080_s0, 512, %s16_s10, [#allocation3], %s969_s19, %s969_s19, %s970_s20  }
  0x13   :  { %s971_s23 = smov [#allocation5]   ;;  %s918_s27 = scalar_lea.hbm %s1081_s1, 1792 }
  0x14   :  { %s27_s24 = sshll.u32 %s971_s23, 4  ;;  %p919_p8 = scmp.ne.s32.totalorder %s1081_s1, %s918_s27  ;;  %s28_s24 = int_to_ptr.vmem [resolvable:$true] %s27_s24 }
  0x15   :  { %p922_p9 = scmp.lt.u32.totalorder %s918_s27, %s1081_s1 }
  0x17   :  { %p924_p10 = pnand %p922_p9, %p919_p8 }
  0x19   :  { %927 = shalt.err (!%p924_p10)
}
  0x1a   :  { %s928_s4 = scalar_lea.vmem %s28_s24, 1792  ;;  %p933_p12 = scmp.lt.s32.totalorder %s28_s24, %s28_s24 }
  0x1b   :  { %p929_p11 = scmp.ne.s32.totalorder %s28_s24, %s928_s4  ;;  %p934_p13 = scmp.lt.s32.totalorder %s928_s4, %s928_s4 }
  0x1d   :  { %p935_p0 = por %p934_p13, %p933_p12 }
  0x1f   :  { %p936_p1 = pnand %p935_p0, %p929_p11 }
  0x21   :  { %939 = shalt.err (!%p936_p1)
}
  0x22   :  { %s972_s0 = smov 128   ;;  %s973_s5 = smov 8  }
  0x23   :  { %33 = dma.hbm_to_vmem [thread:$0]  %s1081_s1, 1792, %s28_s24, [#allocation6], %s972_s0, %s972_s0, %s973_s5  }
  0x24   :  { %962 = dma.done.wait [#allocation3], 512  }
  0x25   :  { %963 = vsyncadd [#allocation3], 4294966784 }
  0x26   :  { %964 = dma.done.wait [#allocation6], 1792  }
  0x27   :  { %965 = vsyncadd [#allocation6], 4294965504  ;;  %v974_v0 = vmov 1   ;;  %v975_v1 = vmov 0   ;;  %v44_v2 = vld [vmem:[#allocation5 + $0x60] sm:$0xff]  ;;  %v976_v4 = vmov 0.0  }
  0x28   :  { %874 = vset.pattern.permute.xlu1 %v974_v0  ;;  %873 = vset.pattern.permute.xlu0 %v975_v1  ;;  %v45_v3 = vld [vmem:[#allocation5 + $0x68] sm:$0x1]  ;;  %vm46_vm0 = vcmask 1040384   ;;  %v42_v5 = vld [vmem:[#allocation2 + $0x10] sm:$0x1]  ;;  %v40_v7 = vld [vmem:[#allocation2] sm:$0xff] }
  0x29   :  { %115 = vperm.xlu1 %874, %v44_v2   ;;  %102 = vperm.xlu0 %873, %v44_v2   ;;  %v43_v6 = vld [vmem:[#allocation2 + $0x18] sm:$0x1]  ;;  %v47_v8 = vsel %vm46_vm0, %v42_v5, 0.0  ;;  %v41_v9 = vld [vmem:[#allocation2 + $0x8] sm:$0xff]  ;;  %v1029_v11 = vld [vmem:[#allocation5] sm:$0xff]  ;;  %v977_v13 = vmov 9  }
  0x2a   :  { %237 = vmatprep.mubr.f32.mxu0 %v976_v4  ;;  %366 = vmatprep.mubr.f32.mxu1 %v976_v4  ;;  %v55_v10 = vsel %vm46_vm0, %v43_v6, 0.0  ;;  %v1031_v12 = vld [vmem:[#allocation5 + $0x8] sm:$0xff]  ;;  %v48_v14 = vadd.f32 %v47_v8, %v40_v7  ;;  %v1035_v16 = vld [vmem:[#allocation5 + $0x10] sm:$0xff]  ;;  %v1037_v17 = vld [vmem:[#allocation5 + $0x18] sm:$0xff]  ;;  %vm978_vm1 = vmmov 1   ;;  %vm156_vm3 = vcmask 72704  }
  0x2b   :  { %v56_v15 = vadd.f32 %v55_v10, %v41_v9  ;;  %v1041_v20 = vld [vmem:[#allocation5 + $0x20] sm:$0xf]  ;;  %vm830_vm2 = vmpackc.low %vm46_vm0, %vm978_vm1  ;;  %vm295_vm4 = vcmask 1043456   ;;  %vm290_vm5 = vcmask 293888   ;;  %vm400_vm6 = vcmask 1046528   ;;  %s985_s1 = smov [#allocation7]  }
  0x2c   :  { %v49_v18 = vrot.slane %v48_v14, 4  ;;  %vm844_vm7 = vmpackc.low %vm400_vm6, %vm978_vm1  ;;  %vm395_vm8 = vcmask 121856   ;;  %vm494_vm10 = vcmask 97280   ;;  %vm585_vm11 = vcmask 1045504   ;;  %s793_s8 = sshll.u32 %s985_s1, 4  ;;  %s794_s8 = int_to_ptr.vmem [resolvable:$true] %s793_s8 }
  0x2d   :  { %119 = vperm.xlu1 %874, %v45_v3   ;;  %107 = vperm.xlu0 %873, %v45_v3   ;;  %v57_v19 = vrot.slane %v56_v15, 4  ;;  %vm850_vm9 = vmpackc.low %vm295_vm4, %vm978_vm1  ;;  %vm582_vm12 = vcmask 48128   ;;  %vm674_vm13 = vcmask 1042432   ;;  %vm671_vm14 = vcmask 23552   ;;  %s940_s9 = scalar_lea.vmem %s794_s8, 32  ;;  %p945_p3 = scmp.lt.s32.totalorder %s794_s8, %s794_s8 }
  0x2e   :  { %v50_v21 = vadd.f32 %v49_v18, %v48_v14  ;;  %p941_p2 = scmp.ne.s32.totalorder %s794_s8, %s940_s9  ;;  %p946_p4 = scmp.lt.s32.totalorder %s940_s9, %s940_s9 }
  0x2f   :  { %v58_v22 = vadd.f32 %v57_v19, %v56_v15 }
  0x30   :  { %v51_v23 = vrot.slane %v50_v21, 2  ;;  %p947_p5 = por %p946_p4, %p945_p3 }
  0x31   :  { %875 = vset.pattern.permute.xlu0 %v977_v13  ;;  %876 = vset.pattern.permute.xlu1 %v977_v13  ;;  %v59_v24 = vrot.slane %v58_v22, 2 }
  0x32   :  { %133 = vperm.xlu0 %875, %v1029_v11   ;;  %138 = vperm.xlu1 %876, %v1031_v12   ;;  %v52_v25 = vadd.f32 %v51_v23, %v50_v21  ;;  %v278_v23 = vld [vmem:[#allocation5 + $0x28] sm:$0xff]  ;;  %p948_p6 = pnand %p947_p5, %p941_p2 }
  0x33   :  { %v60_v26 = vadd.f32 %v59_v24, %v58_v22  ;;  %v979_v24 = vmov 36  }
  0x34   :  { %v53_v27 = vrot.slane %v52_v25, 1 }
  0x35   :  { %v61_v28 = vrot.slane %v60_v26, 1 }
  0x36   :  { %143 = vperm.xlu1 %876, %v1035_v16   ;;  %148 = vperm.xlu0 %875, %v1037_v17   ;;  %v54_v29 = vadd.f32 %v53_v27, %v52_v25 }
  0x37   :  { %v62_v30 = vadd.f32 %v61_v28, %v60_v26 }
  0x38   :  { %v64_v31 = vmul.f32 0.11111111, %v54_v29 }
  0x39   :  { %v65_v32 = vmul.f32 0.11111111, %v62_v30 }
  0x3a   :  { %153 = vperm.xlu1 %876, %v1041_v20   ;;  %v68_v33 = vsub.f32 %v42_v5, %v64_v31  ;;  %v66_v35 = vsub.f32 %v40_v7, %v64_v31  ;;  %877 = vset.pattern.permute.xlu0 %v979_v24 }
  0x3b   :  { %v69_v34 = vsub.f32 %v43_v6, %v65_v32  ;;  %v67_v36 = vsub.f32 %v41_v9, %v65_v32  ;;  %282 = vperm.xlu0 %877, %v278_v23  }
  0x3c   :  { %v72_v37 = vmul.f32 %v68_v33, %v68_v33  ;;  %v70_v39 = vmul.f32 %v66_v35, %v66_v35 }
  0x3d   :  { %v73_v38 = vmul.f32 %v69_v34, %v69_v34  ;;  %v71_v40 = vmul.f32 %v67_v36, %v67_v36 }
  0x3e   :  { %v74_v41 = vsel %vm46_vm0, %v72_v37, 0.0  ;;  %878 = vset.pattern.permute.xlu1 %v979_v24 }
  0x3f   :  { %v82_v42 = vsel %vm46_vm0, %v73_v38, 0.0  ;;  %v75_v43 = vadd.f32 %v74_v41, %v70_v39 }
  0x40   :  { %v83_v44 = vadd.f32 %v82_v42, %v71_v40 }
  0x41   :  { %v76_v45 = vrot.slane %v75_v43, 4 }
  0x42   :  { %v84_v46 = vrot.slane %v83_v44, 4 }
  0x43   :  { %v77_v47 = vadd.f32 %v76_v45, %v75_v43 }
  0x44   :  { %v85_v48 = vadd.f32 %v84_v46, %v83_v44 }
  0x45   :  { %v78_v49 = vrot.slane %v77_v47, 2 }
  0x46   :  { %v86_v50 = vrot.slane %v85_v48, 2 }
  0x47   :  { %v79_v51 = vadd.f32 %v78_v49, %v77_v47 }
  0x48   :  { %v87_v52 = vadd.f32 %v86_v50, %v85_v48 }
  0x49   :  { %v80_v53 = vrot.slane %v79_v51, 1 }
  0x4a   :  { %v88_v54 = vrot.slane %v87_v52, 1 }
  0x4b   :  { %v81_v55 = vadd.f32 %v80_v53, %v79_v51 }
  0x4c   :  { %v89_v56 = vadd.f32 %v88_v54, %v87_v52 }
  0x4d   :  { %v90_v57 = vmul.f32 0.11111111, %v81_v55 }
  0x4e   :  { %v91_v58 = vmul.f32 0.11111111, %v89_v56 }
  0x4f   :  { %v92_v59 = vadd.f32 1e-05, %v90_v57 }
  0x50   :  { %v93_v60 = vadd.f32 1e-05, %v91_v58 }
  0x51   :  { %884 = vrsqrt.f32 %v92_v59 }
  0x52   :  { %886 = vrsqrt.f32 %v93_v60  ;;  %v383_v60 = vld [vmem:[#allocation5 + $0x38] sm:$0xff] }
  0x5b   :  { %v885_v61 = vpop.eup %884 }
  0x5c   :  { %v887_v62 = vpop.eup %886  ;;  %v96_v63 = vmul.f32 %v885_v61, %v66_v35  ;;  %v98_v3 = vmul.f32 %v885_v61, %v68_v33  ;;  %v384_v61 = vld [vmem:[#allocation5 + $0x40] sm:$0xf] }
  0x5d   :  { %v97_v0 = vmul.f32 %v887_v62, %v67_v36  ;;  %v99_v5 = vmul.f32 %v887_v62, %v69_v34  ;;  %v980_v62 = vmov 15  }
  0x5e   :  { %880 = vset.pattern.permute.xlu0 %v980_v62 }
  0x5f   :  { %392 = vperm.xlu0 %880, %v384_v61  }
  0xa8   :  { %v116_v1 = vpop.permute.xlu1 %115  ;;  %v103_v2 = vpop.permute.xlu0 %102 }
  0xa9   :  { %v110_v6 = vmul.f32 %v103_v2, %v96_v63  ;;  %v111_v7 = vmul.f32 %v103_v2, %v97_v0 }
  0xab   :  { %v122_v14 = vadd.f32 %v116_v1, %v110_v6  ;;  %v123_v18 = vadd.f32 %v116_v1, %v111_v7 }
  0xac   :  { %v108_v8 = vpop.permute.xlu0 %107  ;;  %v120_v13 = vpop.permute.xlu1 %119 }
  0xad   :  { %v112_v9 = vmul.f32 %v108_v8, %v98_v3  ;;  %v113_v10 = vmul.f32 %v108_v8, %v99_v5 }
  0xaf   :  { %v124_v15 = vadd.f32 %v120_v13, %v112_v9  ;;  %v125_v19 = vadd.f32 %v120_v13, %v113_v10 }
  0xb1   :  { %v829_v21 = vpack.c.bf16 %v125_v19, %v123_v18  ;;  %v832_v22 = vpack.c.bf16 %v124_v15, %v122_v14  ;;  %v139_v27 = vpop.permute.xlu1 %138 }
  0xb3   :  { %831 = vmatprep.subr.msk.bf16.mxu0 %vm830_vm2, %v829_v21  ;;  %v488_v21 = vld [vmem:[#allocation5 + $0x48] sm:$0x3f] }
  0xb4   :  { %834 = vmatpush1.bf16.msk.msra.mxu0 %vm830_vm2, %v832_v22  ;;  %v981_v22 = vmov 12  }
  0xb5   :  { %v144_v38 = vpop.permute.xlu1 %143 }
  0xb7   :  { %805 = vmatmul.mubr.msk.f32.vlgmr.msra.gmra.mrb[0].mxu0 %vm156_vm3, %v1029_v11  ;;  %v279_v11 = vld [vmem:[#allocation5 + $0x30] sm:$0x7f] }
  0xb8   :  { %243 = vmatprep.mubr.f32.mxu0 %v976_v4  ;;  %287 = vperm.xlu1 %878, %v279_v11  }
  0xb9   :  { %v154_v52 = vpop.permute.xlu1 %153 }
  0xbb   :  { %806 = vmatmul.mubr.msk.f32.gmra.mrb[2].mxu0 %vm156_vm3, %v1031_v12  ;;  %v134_v12 = vpop.permute.xlu0 %133 }
  0xbc   :  { %249 = vmatprep.mubr.f32.mxu0 %v976_v4  ;;  %879 = vset.pattern.permute.xlu1 %v980_v62  ;;  %v984_v62 = vmov 1966171168  }
  0xbd   :  { %387 = vperm.xlu1 %879, %v383_v60  }
  0xbf   :  { %807 = vmatmul.mubr.msk.f32.gmra.mrb[4].mxu0 %vm156_vm3, %v1035_v16  ;;  %v149_v41 = vpop.permute.xlu0 %148 }
  0xc0   :  { %255 = vmatprep.mubr.f32.mxu0 %v976_v4 }
  0xc1   :  { %881 = vset.pattern.permute.xlu1 %v981_v22 }
  0xc2   :  { %491 = vperm.xlu1 %881, %v488_v21  }
  0xc3   :  { %808 = vmatmul.mubr.msk.f32.gmra.mrb[6].mxu0 %vm156_vm3, %v1037_v17  ;;  %v283_v63 = vpop.permute.xlu0 %282 }
  0xc4   :  { %261 = vmatprep.mubr.f32.mxu0 %v976_v4 }
  0xc7   :  { %809 = vmatmul.mubr.msk.f32.gmra.mrb[8].mxu0 %vm156_vm3, %v1041_v20 }
  0xc8   :  { %567 = vmatprep.mubr.f32.mxu0 %v976_v4 }
 0x137   :  { %v288_v2 = vpop.permute.xlu1 %287 }
 0x18a   :  { %v239_v25 = vpop.f32.mrb[0].mxu0 }
 0x18b   :  { %v241_v16 = vpop.f32.mrb[1].mxu0  ;;  %v240_v26 = vadd.f32 %v239_v25, %v134_v12 }
 0x18c   :  { %v242_v28 = vadd.f32 %v241_v16, %v134_v12  ;;  %v393_v12 = vpop.permute.xlu0 %392 }
 0x18d   :  { %v268_v20 = vmax.f32 %v240_v26, 0.0 }
 0x18e   :  { %v245_v17 = vpop.f32.mrb[2].mxu0  ;;  %v269_v33 = vmax.f32 %v242_v28, 0.0 }
 0x18f   :  { %v246_v29 = vadd.f32 %v245_v17, %v139_v27  ;;  %v247_v30 = vpop.f32.mrb[3].mxu0 }
 0x190   :  { %v248_v31 = vadd.f32 %v247_v30, %v139_v27 }
 0x191   :  { %v270_v32 = vmax.f32 %v246_v29, 0.0 }
 0x192   :  { %v271_v34 = vmax.f32 %v248_v31, 0.0  ;;  %v251_v35 = vpop.f32.mrb[4].mxu0 }
 0x193   :  { %v253_v36 = vpop.f32.mrb[5].mxu0  ;;  %v837_v37 = vpack.c.bf16 %v270_v32, %v268_v20  ;;  %v252_v40 = vadd.f32 %v251_v35, %v144_v38  ;;  %v982_v35 = vmov 6  }
 0x194   :  { %v835_v39 = vpack.c.bf16 %v271_v34, %v269_v33  ;;  %v254_v42 = vadd.f32 %v253_v36, %v144_v38  ;;  %v576_v34 = vld [vmem:[#allocation5 + $0x50] sm:$0x7]  ;;  %882 = vset.pattern.permute.xlu1 %v982_v35 }
 0x195   :  { %v272_v47 = vmax.f32 %v252_v40, 0.0  ;;  %579 = vperm.xlu1 %882, %v576_v34  }
 0x196   :  { %v257_v43 = vpop.f32.mrb[6].mxu0  ;;  %836 = vmatprep.subr.bf16.mxu1 %v835_v39  ;;  %v273_v49 = vmax.f32 %v254_v42, 0.0 }
 0x197   :  { %v258_v44 = vadd.f32 %v257_v43, %v149_v41  ;;  %v259_v45 = vpop.f32.mrb[7].mxu0  ;;  %838 = vmatpush1.bf16.msra.mxu1 %v837_v37  ;;  %v665_v43 = vld [vmem:[#allocation5 + $0x58] sm:$0x1] }
 0x198   :  { %v260_v46 = vadd.f32 %v259_v45, %v149_v41 }
 0x199   :  { %v274_v48 = vmax.f32 %v258_v44, 0.0  ;;  %v983_v44 = vmov 3  }
 0x19a   :  { %v275_v50 = vmax.f32 %v260_v46, 0.0  ;;  %v263_v51 = vpop.f32.mrb[8].mxu0  ;;  %883 = vset.pattern.permute.xlu0 %v983_v44 }
 0x19b   :  { %v841_v53 = vpack.c.bf16 %v274_v48, %v272_v47  ;;  %v265_v54 = vpop.f32.mrb[9].mxu0  ;;  %v264_v57 = vadd.f32 %v263_v51, %v154_v52  ;;  %668 = vperm.xlu0 %883, %v665_v43  }
 0x19c   :  { %v839_v55 = vpack.c.bf16 %v275_v50, %v273_v49  ;;  %v266_v56 = vadd.f32 %v265_v54, %v154_v52 }
 0x19d   :  { %v276_v59 = vmax.f32 %v264_v57, 0.0 }
 0x19e   :  { %v277_v58 = vmax.f32 %v266_v56, 0.0  ;;  %840 = vmatprep.subr.bf16.mxu1 %v839_v55 }
 0x19f   :  { %842 = vmatpush1.bf16.msra.mxu1 %v841_v53 }
 0x1a0   :  { %810 = vmatprep.subr.msk.mxu1 %vm295_vm4, %v277_v58 }
 0x1a3   :  { %811 = vmatpush1.msk.msra.mxu1 %vm295_vm4, %v276_v59 }
 0x1a4   :  { %812 = vmatmul.mubr.msk.f32.vlgmr.msra.gmra.mrb[0].mxu1 %vm290_vm5, %v278_v23  ;;  %v388_v23 = vpop.permute.xlu1 %387 }
 0x1a5   :  { %372 = vmatprep.mubr.f32.mxu1 %v976_v4 }
 0x1a8   :  { %813 = vmatmul.mubr.msk.f32.gmra.mrb[2].mxu1 %vm290_vm5, %v279_v11  ;;  %v492_v36 = vpop.permute.xlu1 %491 }
 0x1a9   :  { %471 = vmatprep.mubr.f32.mxu1 %v976_v4 }
 0x21a   :  { %v669_v51 = vpop.permute.xlu0 %668 }
 0x277   :  { %v368_v0 = vpop.f32.mrb[0].mxu1 }
 0x278   :  { %v370_v1 = vpop.f32.mrb[1].mxu1  ;;  %v369_v3 = vadd.f32 %v368_v0, %v283_v63  ;;  %v770_v0 = vlaneseq }
 0x279   :  { %v371_v5 = vadd.f32 %v370_v1, %v283_v63  ;;  %v768_v63 = vunpack.c.l.s4 %v984_v62 }
 0x27a   :  { %v379_v10 = vmax.f32 %v369_v3, 0.0  ;;  %vm784_vm15 = vcmp.lt.s32.totalorder %v770_v0, 256 }
 0x27b   :  { %v374_v6 = vpop.f32.mrb[2].mxu1  ;;  %v380_v14 = vmax.f32 %v371_v5, 0.0  ;;  %v769_v1 = vunpack.c.0.s8 %v768_v63 }
 0x27c   :  { %v375_v7 = vadd.f32 %v374_v6, %v288_v2  ;;  %v376_v8 = vpop.f32.mrb[3].mxu1 }
 0x27d   :  { %v377_v9 = vadd.f32 %v376_v8, %v288_v2  ;;  %v771_v2 = vshrl.u32 %v770_v0, 7 }
 0x27e   :  { %v381_v13 = vmax.f32 %v375_v7, 0.0 }
 0x27f   :  { %v382_v15 = vmax.f32 %v377_v9, 0.0  ;;  %v772_v5 = vsub.s32 %v769_v1, %v771_v2 }
 0x280   :  { %v846_v18 = vpack.c.bf16 %v381_v13, %v379_v10 }
 0x281   :  { %v843_v19 = vpack.c.bf16 %v382_v15, %v380_v14 }
 0x283   :  { %845 = vmatprep.subr.msk.bf16.mxu1 %vm844_vm7, %v843_v19 }
 0x284   :  { %848 = vmatpush1.bf16.msk.msra.mxu1 %vm844_vm7, %v846_v18 }
 0x287   :  { %816 = vmatmul.mubr.msk.f32.vlgmr.msra.gmra.mrb[4].mxu1 %vm395_vm8, %v383_v60 }
 0x288   :  { %477 = vmatprep.mubr.f32.mxu1 %v976_v4 }
 0x28b   :  { %817 = vmatmul.mubr.msk.f32.gmra.mrb[6].mxu1 %vm395_vm8, %v384_v61 }
 0x28c   :  { %656 = vmatprep.mubr.f32.mxu1 %v976_v4 }
 0x35a   :  { %v473_v11 = vpop.f32.mrb[4].mxu1 }
 0x35b   :  { %v475_v24 = vpop.f32.mrb[5].mxu1  ;;  %v474_v25 = vadd.f32 %v473_v11, %v388_v23 }
 0x35c   :  { %v476_v16 = vadd.f32 %v475_v24, %v388_v23 }
 0x35d   :  { %v484_v29 = vmax.f32 %v474_v25, 0.0 }
 0x35e   :  { %v479_v26 = vpop.f32.mrb[6].mxu1  ;;  %v485_v31 = vmax.f32 %v476_v16, 0.0 }
 0x35f   :  { %v480_v27 = vadd.f32 %v479_v26, %v393_v12  ;;  %v481_v28 = vpop.f32.mrb[7].mxu1 }
 0x360   :  { %v482_v17 = vadd.f32 %v481_v28, %v393_v12 }
 0x361   :  { %v486_v30 = vmax.f32 %v480_v27, 0.0 }
 0x362   :  { %v487_v20 = vmax.f32 %v482_v17, 0.0 }
 0x363   :  { %v852_v32 = vpack.c.bf16 %v486_v30, %v484_v29 }
 0x364   :  { %v849_v33 = vpack.c.bf16 %v487_v20, %v485_v31 }
 0x366   :  { %851 = vmatprep.subr.msk.bf16.mxu0 %vm850_vm9, %v849_v33 }
 0x367   :  { %854 = vmatpush1.bf16.msk.msra.mxu0 %vm850_vm9, %v852_v32 }
 0x36a   :  { %820 = vmatmul.mubr.msk.f32.vlgmr.msra.gmra.mrb[10].mxu0 %vm494_vm10, %v488_v21 }
 0x36b   :  { %745 = vmatprep.mubr.f32.mxu0 %v976_v4  ;;  %v580_v4 = vpop.permute.xlu1 %579 }
 0x43d   :  { %v569_v37 = vpop.f32.mrb[10].mxu0 }
 0x43e   :  { %v570_v38 = vadd.f32 %v569_v37, %v492_v36  ;;  %v571_v39 = vpop.f32.mrb[11].mxu0 }
 0x43f   :  { %v572_v40 = vadd.f32 %v571_v39, %v492_v36 }
 0x440   :  { %v574_v42 = vmax.f32 %v570_v38, 0.0 }
 0x441   :  { %v575_v41 = vmax.f32 %v572_v40, 0.0 }
 0x443   :  { %821 = vmatprep.subr.msk.mxu1 %vm585_vm11, %v575_v41 }
 0x444   :  { %822 = vmatpush1.msk.msra.mxu1 %vm585_vm11, %v574_v42 }
 0x445   :  { %823 = vmatmul.mubr.msk.f32.vlgmr.msra.gmra.mrb[8].mxu1 %vm582_vm12, %v576_v34 }
 0x518   :  { %v658_v45 = vpop.f32.mrb[8].mxu1 }
 0x519   :  { %v659_v46 = vadd.f32 %v658_v45, %v580_v4  ;;  %v660_v47 = vpop.f32.mrb[9].mxu1 }
 0x51a   :  { %v661_v48 = vadd.f32 %v660_v47, %v580_v4 }
 0x51b   :  { %v663_v50 = vmax.f32 %v659_v46, 0.0 }
 0x51c   :  { %v664_v49 = vmax.f32 %v661_v48, 0.0 }
 0x51e   :  { %824 = vmatprep.subr.msk.mxu0 %vm674_vm13, %v664_v49 }
 0x51f   :  { %825 = vmatpush1.msk.msra.mxu0 %vm674_vm13, %v663_v50 }
 0x520   :  { %826 = vmatmul.mubr.msk.f32.vlgmr.msra.gmra.mrb[12].mxu0 %vm671_vm14, %v665_v43 }
 0x5f3   :  { %v747_v52 = vpop.f32.mrb[12].mxu0 }
 0x5f4   :  { %v748_v53 = vadd.f32 %v747_v52, %v669_v51  ;;  %v749_v54 = vpop.f32.mrb[13].mxu0 }
 0x5f5   :  { %v750_v55 = vadd.f32 %v749_v54, %v669_v51 }
 0x5f6   :  { %v827_v56 = vmul.f32 -1.442695, %v748_v53 }
 0x5f7   :  { %v828_v57 = vmul.f32 -1.442695, %v750_v55 }
 0x5f8   :  { %888 = vpow2.f32 %v827_v56 }
 0x5f9   :  { %890 = vpow2.f32 %v828_v57 }
 0x602   :  { %v889_v58 = vpop.eup %888 }
 0x603   :  { %v891_v59 = vpop.eup %890  ;;  %v758_v60 = vadd.f32 1.0, %v889_v58 }
 0x604   :  { %v759_v61 = vadd.f32 1.0, %v891_v59 }
 0x605   :  { %892 = vrcp.f32 %v758_v60 }
 0x606   :  { %894 = vrcp.f32 %v759_v61 }
 0x60f   :  { %v893_v3 = vpop.eup %892 }
 0x610   :  { %v895_v6 = vpop.eup %894 }
 0x611   :  { %v766_v7 = vcombine.low %v893_v3, %v895_v6 }
 0x613   :  { %v773_v8 = vrot.slane %v766_v7, %v772_v5 }
 0x615   :  { %v780_v9 = vrot.slane %v773_v8, %v772_v5 }
 0x617   :  { %786 = vst.msk [vmem:[#allocation7] sm:$0x3] %vm784_vm15, %v780_v9 }
 0x618   :  { %951 = shalt.err (!%p948_p6)
}
 0x619   :  { %s952_s12 = scalar_lea.hbm %s1082_s2, 32 }
 0x61a   :  { %p953_p7 = scmp.ne.s32.totalorder %s1082_s2, %s952_s12  ;;  %p956_p8 = scmp.lt.u32.totalorder %s952_s12, %s1082_s2 }
 0x61c   :  { %p958_p9 = pnand %p956_p8, %p953_p7 }
 0x61e   :  { %961 = shalt.err (!%p958_p9)
}
 0x61f   :  { %796 = dma.vmem_to_hbm [thread:$0]  %s794_s8, 32, %s1082_s2, [#allocation4]  }
 0x620   :  { %966 = dma.done.wait [#allocation4], 32  }
 0x621   :  { %967 = vsyncadd [#allocation4], 4294967264 }
 0x622   :  { %800 = vsyncpa [#allocation3], 1 }
 0x623   :  { %801 = vsyncpa [#allocation6], 1 }
 0x624   :  { %802 = vsyncpa [#allocation4], 1 }

</bundles_post_ra>
